<compile_context>
chip_gen: v6e
topology: v6e:2x2x1
jax: 0.10.0
libtpu: 0.0.40
codegen_flags: <defaults>
</compile_context>

<pallas_src>
import functools

import jax
import jax.numpy as jnp
from jax import lax
from jax.experimental import pallas as pl
from jax.experimental.pallas import tpu as pltpu


# ----- model hyper-parameters (consistent with NewsClassifier.__init__) -----
EMB_SIZE = 32
NUM_EMB = 64
NUM_CHANNELS = 16
HIDDEN_DIM = 32
NUM_CLASSES = 4
PADDING_IDX = 0
K = 3  # every conv uses kernel_size=3

BATCH = 2
SEQ_LEN = 32


def _round_up(x, m):
    return (x + m - 1) // m * m


# ----- packed-parameter slab layout (SLAB_ROWS x 32 lanes, f32); row offsets 8-aligned -----
SLAB_W = 32
R_EMB = 0                              # (NUM_EMB, EMB_SIZE)          = (64, 32)
R_W1 = R_EMB + NUM_EMB                 # (K*EMB_SIZE, NUM_CHANNELS)   = (96, 16)  im2col
R_W2 = R_W1 + K * EMB_SIZE             # (K*C, C)                     = (48, 16)
R_W3 = R_W2 + K * NUM_CHANNELS
R_W4 = R_W3 + K * NUM_CHANNELS
R_WF1 = R_W4 + K * NUM_CHANNELS        # (NUM_CHANNELS, HIDDEN_DIM)   = (16, 32)
R_WF2 = R_WF1 + NUM_CHANNELS           # (HIDDEN_DIM, NUM_CLASSES)    = (32, 4)
R_B1 = R_WF2 + HIDDEN_DIM              # single bias rows follow
R_B2 = R_B1 + 1
R_B3 = R_B2 + 1
R_B4 = R_B3 + 1
R_BF1 = R_B4 + 1
R_BF2 = R_BF1 + 1
SLAB_ROWS = _round_up(R_BF2 + 1, 8)    # 360


def _elu(x):
    # PyTorch nn.ELU(alpha=1.0): x if x > 0 else exp(x) - 1.
    # (exp(x)-1 instead of expm1: keeps the guaranteed Mosaic lowering; the f32
    #  cancellation for tiny |x| is negligible at this scale.)
    return jnp.where(x > 0, x, jnp.exp(jnp.minimum(x, 0.0)) - 1.0)


def news_classifier_kernel(tok_ref, slab_ref, out_ref, s0, s1, s2, s3,
                           *, batch, seq_len, apply_softmax):
    b_sz = batch
    bl = b_sz * seq_len

    # --- embedding lookup fused in-kernel: one-hot(tokens) @ table (single MXU matmul) ---
    tok = tok_ref[...]                                                 # (B*L, 1) int32
    vocab = lax.broadcasted_iota(jnp.int32, (bl, NUM_EMB), 1)
    onehot = (vocab == tok).astype(jnp.float32)                        # (B*L, NUM_EMB)
    emb_tbl = slab_ref[R_EMB:R_EMB + NUM_EMB, 0:EMB_SIZE]              # (NUM_EMB, E)
    s0[...] = jnp.dot(onehot, emb_tbl, preferred_element_type=jnp.float32)

    # --- packed weights / biases (im2col weight row index = kk*C_in + ci) ---
    w1 = slab_ref[R_W1:R_W1 + K * EMB_SIZE, 0:NUM_CHANNELS]
    w2 = slab_ref[R_W2:R_W2 + K * NUM_CHANNELS, 0:NUM_CHANNELS]
    w3 = slab_ref[R_W3:R_W3 + K * NUM_CHANNELS, 0:NUM_CHANNELS]
    w4 = slab_ref[R_W4:R_W4 + K * NUM_CHANNELS, 0:NUM_CHANNELS]
    b1 = slab_ref[R_B1:R_B1 + 1, 0:NUM_CHANNELS]
    b2 = slab_ref[R_B2:R_B2 + 1, 0:NUM_CHANNELS]
    b3 = slab_ref[R_B3:R_B3 + 1, 0:NUM_CHANNELS]
    b4 = slab_ref[R_B4:R_B4 + 1, 0:NUM_CHANNELS]
    wf1 = slab_ref[R_WF1:R_WF1 + NUM_CHANNELS, 0:HIDDEN_DIM]
    bf1 = slab_ref[R_BF1:R_BF1 + 1, 0:HIDDEN_DIM]
    wf2 = slab_ref[R_WF2:R_WF2 + HIDDEN_DIM, 0:NUM_CLASSES]
    bf2 = slab_ref[R_BF2:R_BF2 + 1, 0:NUM_CLASSES]

    # static conv geometry (matches PyTorch Conv1d output-length formula)
    l1 = seq_len - (K - 1)                    # conv1, stride 1
    l2 = (l1 - K) // 2 + 1                    # conv2, stride 2
    l3 = (l2 - K) // 2 + 1                    # conv3, stride 2
    l4 = l3 - (K - 1)                         # conv4, stride 1
    p1, p2, p3 = _round_up(l1, 8), _round_up(l2, 8), _round_up(l3, 8)  # per-batch row pitch

    def conv_elu(src_ref, pitch_in, l_out, stride, w, bias):
        """One conv layer = one (B*l_out, K*C_in) @ (K*C_in, C_out) matmul + one ELU."""
        cols = []
        for b in range(b_sz):                              # static unroll, B is tiny
            base = b * pitch_in
            taps = []
            for kk in range(K):
                idx = (pl.ds(base + kk, l_out) if stride == 1
                       else pl.ds(base + kk, l_out, stride))
                taps.append(src_ref[idx, :])               # (l_out, C_in)
            cols.append(jnp.concatenate(taps, axis=1))     # (l_out, K*C_in)
        col = jnp.concatenate(cols, axis=0)                # (B*l_out, K*C_in)
        h = jnp.dot(col, w, preferred_element_type=jnp.float32) + bias
        return _elu(h)                                     # (B*l_out, C_out)

    def scatter(dst_ref, h, l_out, pitch_out):
        for b in range(b_sz):
            dst_ref[pl.ds(b * pitch_out, l_out), :] = h[b * l_out:(b + 1) * l_out, :]

    h1 = conv_elu(s0, seq_len, l1, 1, w1, b1)
    scatter(s1, h1, l1, p1)
    h2 = conv_elu(s1, p1, l2, 2, w2, b2)
    scatter(s2, h2, l2, p2)
    h3 = conv_elu(s2, p2, l3, 2, w3, b3)
    scatter(s3, h3, l3, p3)
    h4 = conv_elu(s3, p3, l4, 1, w4, b4)                   # (B*l4, C)

    # F.avg_pool1d over the remaining length, per batch item -> (B, C)
    feat = jnp.concatenate(
        [jnp.mean(h4[b * l4:(b + 1) * l4, :], axis=0, keepdims=True)
         for b in range(b_sz)], axis=0)

    # TODO(synk): F.dropout defaults to training=True (stochastic); implemented with
    # eval semantics (identity) so the kernel is deterministic.
    h = jnp.dot(feat, wf1, preferred_element_type=jnp.float32) + bf1
    h = jnp.maximum(h, 0.0)                                # ReLU
    logits = jnp.dot(h, wf2, preferred_element_type=jnp.float32) + bf2

    if apply_softmax:  # static Python flag, resolved at trace time
        m = jnp.max(logits, axis=1, keepdims=True)
        e = jnp.exp(logits - m)
        logits = e / jnp.sum(e, axis=1, keepdims=True)

    out_ref[...] = logits.astype(out_ref.dtype)


def init_params(key):
    ks = jax.random.split(key, 8)
    emb = 0.1 * jax.random.normal(ks[0], (NUM_EMB, EMB_SIZE), jnp.float32)
    emb = emb.at[PADDING_IDX].set(0.0)  # padding_idx row is zero in nn.Embedding
    return {
        "emb": emb,
        # Conv weights as (K, C_in, C_out); biases as (C_out,)
        "w1": 0.1 * jax.random.normal(ks[1], (K, EMB_SIZE, NUM_CHANNELS), jnp.float32),
        "b1": jnp.zeros((NUM_CHANNELS,), jnp.float32),
        "w2": 0.1 * jax.random.normal(ks[2], (K, NUM_CHANNELS, NUM_CHANNELS), jnp.float32),
        "b2": jnp.zeros((NUM_CHANNELS,), jnp.float32),
        "w3": 0.1 * jax.random.normal(ks[3], (K, NUM_CHANNELS, NUM_CHANNELS), jnp.float32),
        "b3": jnp.zeros((NUM_CHANNELS,), jnp.float32),
        "w4": 0.1 * jax.random.normal(ks[4], (K, NUM_CHANNELS, NUM_CHANNELS), jnp.float32),
        "b4": jnp.zeros((NUM_CHANNELS,), jnp.float32),
        # Linear weights as (in, out)
        "wf1": 0.1 * jax.random.normal(ks[5], (NUM_CHANNELS, HIDDEN_DIM), jnp.float32),
        "bf1": 0.01 * jax.random.normal(ks[6], (HIDDEN_DIM,), jnp.float32),
        "wf2": 0.1 * jax.random.normal(ks[7], (HIDDEN_DIM, NUM_CLASSES), jnp.float32),
        "bf2": jnp.zeros((NUM_CLASSES,), jnp.float32),
    }


def pack_params(params):
    """Pack embedding + all weights/biases into one (SLAB_ROWS, 32) f32 slab (call once)."""
    slab = jnp.zeros((SLAB_ROWS, SLAB_W), jnp.float32)

    def put(s, row, arr):
        arr = jnp.asarray(arr, jnp.float32)
        if arr.ndim == 1:
            arr = arr.reshape(1, -1)
        return s.at[row:row + arr.shape[0], 0:arr.shape[1]].set(arr)

    slab = put(slab, R_EMB, params["emb"])
    slab = put(slab, R_W1, params["w1"].reshape(K * EMB_SIZE, NUM_CHANNELS))
    slab = put(slab, R_W2, params["w2"].reshape(K * NUM_CHANNELS, NUM_CHANNELS))
    slab = put(slab, R_W3, params["w3"].reshape(K * NUM_CHANNELS, NUM_CHANNELS))
    slab = put(slab, R_W4, params["w4"].reshape(K * NUM_CHANNELS, NUM_CHANNELS))
    slab = put(slab, R_WF1, params["wf1"])
    slab = put(slab, R_WF2, params["wf2"])
    slab = put(slab, R_B1, params["b1"])
    slab = put(slab, R_B2, params["b2"])
    slab = put(slab, R_B3, params["b3"])
    slab = put(slab, R_B4, params["b4"])
    slab = put(slab, R_BF1, params["bf1"])
    slab = put(slab, R_BF2, params["bf2"])
    return slab


@functools.partial(jax.jit, static_argnames=("apply_softmax",))
def news_classifier_forward(x_in, slab, apply_softmax=False):
    b, l = x_in.shape
    tok = x_in.reshape(b * l, 1).astype(jnp.int32)

    l1 = l - (K - 1)
    l2 = (l1 - K) // 2 + 1
    l3 = (l2 - K) // 2 + 1
    p1, p2, p3 = _round_up(l1, 8), _round_up(l2, 8), _round_up(l3, 8)

    kernel = functools.partial(
        news_classifier_kernel, batch=b, seq_len=l, apply_softmax=apply_softmax)

    return pl.pallas_call(
        kernel,
        out_shape=jax.ShapeDtypeStruct((b, NUM_CLASSES), jnp.float32),
        in_specs=[pl.BlockSpec(memory_space=pltpu.MemorySpace.VMEM),   # token ids
                  pl.BlockSpec(memory_space=pltpu.MemorySpace.VMEM)],  # packed weight slab
        out_specs=pl.BlockSpec(memory_space=pltpu.MemorySpace.VMEM),
        scratch_shapes=[
            pltpu.VMEM((b * l, EMB_SIZE), jnp.float32),       # embedded tokens
            pltpu.VMEM((b * p1, NUM_CHANNELS), jnp.float32),  # conv1 activations
            pltpu.VMEM((b * p2, NUM_CHANNELS), jnp.float32),  # conv2 activations
            pltpu.VMEM((b * p3, NUM_CHANNELS), jnp.float32),  # conv3 activations
        ],
    )(tok, slab)


if __name__ == "__main__":
    key = jax.random.PRNGKey(0)
    k_param, k_tok = jax.random.split(key)

    params = init_params(k_param)
    slab = pack_params(params)   # one-time host-side packing; forward consumes the slab
    x_in = jax.random.randint(k_tok, (BATCH, SEQ_LEN), 0, NUM_EMB, dtype=jnp.int32)

    logits = news_classifier_forward(x_in, slab, apply_softmax=False)
    jax.block_until_ready(logits)
    assert logits.shape == (BATCH, NUM_CLASSES)
    assert bool(jnp.all(jnp.isfinite(logits)))
    print("KERNEL_OK")
</pallas_src>

<mosaic_0001>
module attributes {stable_mosaic.version = 11 : i64} {
  func.func @news_classifier_kernel(%arg0: memref<64x1xi32, #tpu.memory_space<vmem>>, %arg1: memref<360x32xf32, #tpu.memory_space<vmem>>, %arg2: memref<2x4xf32, #tpu.memory_space<vmem>>, %arg3: memref<64x32xf32, #tpu.memory_space<vmem>>, %arg4: memref<64x16xf32, #tpu.memory_space<vmem>>, %arg5: memref<32x16xf32, #tpu.memory_space<vmem>>, %arg6: memref<16x16xf32, #tpu.memory_space<vmem>>) attributes {dimension_semantics = [], scalar_prefetch = 0 : i64, scratch_operands = 4 : i64, tpu.core_type = #tpu.core_type<tc>} {
    %c0 = arith.constant 0 : index
    %c0_0 = arith.constant 0 : index
    %0 = vector.load %arg0[%c0, %c0_0] : memref<64x1xi32, #tpu.memory_space<vmem>>, vector<64x1xi32>
    %1 = tpu.iota {dimensions = array<i32: 1>} : vector<64x64xi32>
    %2 = vector.broadcast %0 : vector<64x1xi32> to vector<64x64xi32>
    %3 = arith.cmpi eq, %1, %2 : vector<64x64xi32>
    %4 = arith.extui %3 : vector<64x64xi1> to vector<64x64xi32>
    %5 = arith.sitofp %4 : vector<64x64xi32> to vector<64x64xf32>
    %c0_1 = arith.constant 0 : index
    %c0_2 = arith.constant 0 : index
    %6 = vector.load %arg1[%c0_1, %c0_2] : memref<360x32xf32, #tpu.memory_space<vmem>>, vector<64x32xf32>
    %cst = arith.constant dense<0.000000e+00> : vector<64x32xf32>
    %7 = tpu.matmul %5, %6, %cst {dimension_numbers = #tpu.dot_dimension_numbers<[1], [0], [0], [1], [0, 0, 1, 1], [], []>} : vector<64x64xf32>, vector<64x32xf32>, vector<64x32xf32> -> vector<64x32xf32>
    %c0_3 = arith.constant 0 : index
    %c0_4 = arith.constant 0 : index
    %8 = vector.load %arg3[%c0_3, %c0_4] : memref<64x32xf32, #tpu.memory_space<vmem>>, vector<64x32xf32>
    tpu.vector_store %arg3[%c0_3, %c0_4], %7 {strides = array<i32>} : memref<64x32xf32, #tpu.memory_space<vmem>>, vector<64x32xf32>,
    %c64 = arith.constant 64 : index
    %c0_5 = arith.constant 0 : index
    %9 = vector.load %arg1[%c64, %c0_5] : memref<360x32xf32, #tpu.memory_space<vmem>>, vector<96x16xf32>
    %c160 = arith.constant 160 : index
    %c0_6 = arith.constant 0 : index
    %10 = vector.load %arg1[%c160, %c0_6] : memref<360x32xf32, #tpu.memory_space<vmem>>, vector<48x16xf32>
    %c208 = arith.constant 208 : index
    %c0_7 = arith.constant 0 : index
    %11 = vector.load %arg1[%c208, %c0_7] : memref<360x32xf32, #tpu.memory_space<vmem>>, vector<48x16xf32>
    %c256 = arith.constant 256 : index
    %c0_8 = arith.constant 0 : index
    %12 = vector.load %arg1[%c256, %c0_8] : memref<360x32xf32, #tpu.memory_space<vmem>>, vector<48x16xf32>
    %c352 = arith.constant 352 : index
    %c0_9 = arith.constant 0 : index
    %13 = vector.load %arg1[%c352, %c0_9] : memref<360x32xf32, #tpu.memory_space<vmem>>, vector<1x16xf32>
    %c353 = arith.constant 353 : index
    %c0_10 = arith.constant 0 : index
    %14 = vector.load %arg1[%c353, %c0_10] : memref<360x32xf32, #tpu.memory_space<vmem>>, vector<1x16xf32>
    %c354 = arith.constant 354 : index
    %c0_11 = arith.constant 0 : index
    %15 = vector.load %arg1[%c354, %c0_11] : memref<360x32xf32, #tpu.memory_space<vmem>>, vector<1x16xf32>
    %c355 = arith.constant 355 : index
    %c0_12 = arith.constant 0 : index
    %16 = vector.load %arg1[%c355, %c0_12] : memref<360x32xf32, #tpu.memory_space<vmem>>, vector<1x16xf32>
    %c304 = arith.constant 304 : index
    %c0_13 = arith.constant 0 : index
    %17 = vector.load %arg1[%c304, %c0_13] : memref<360x32xf32, #tpu.memory_space<vmem>>, vector<16x32xf32>
    %c356 = arith.constant 356 : index
    %c0_14 = arith.constant 0 : index
    %18 = vector.load %arg1[%c356, %c0_14] : memref<360x32xf32, #tpu.memory_space<vmem>>, vector<1x32xf32>
    %c320 = arith.constant 320 : index
    %c0_15 = arith.constant 0 : index
    %19 = vector.load %arg1[%c320, %c0_15] : memref<360x32xf32, #tpu.memory_space<vmem>>, vector<32x4xf32>
    %c357 = arith.constant 357 : index
    %c0_16 = arith.constant 0 : index
    %20 = vector.load %arg1[%c357, %c0_16] : memref<360x32xf32, #tpu.memory_space<vmem>>, vector<1x4xf32>
    %c0_17 = arith.constant 0 : index
    %c0_18 = arith.constant 0 : index
    %21 = vector.load %arg3[%c0_17, %c0_18] : memref<64x32xf32, #tpu.memory_space<vmem>>, vector<30x32xf32>
    %c1 = arith.constant 1 : index
    %c0_19 = arith.constant 0 : index
    %22 = vector.load %arg3[%c1, %c0_19] : memref<64x32xf32, #tpu.memory_space<vmem>>, vector<30x32xf32>
    %c2 = arith.constant 2 : index
    %c0_20 = arith.constant 0 : index
    %23 = vector.load %arg3[%c2, %c0_20] : memref<64x32xf32, #tpu.memory_space<vmem>>, vector<30x32xf32>
    %24 = tpu.concatenate %21, %22, %23 in 1 : vector<30x32xf32>, vector<30x32xf32>, vector<30x32xf32> -> vector<30x96xf32>
    %c32 = arith.constant 32 : index
    %c0_21 = arith.constant 0 : index
    %25 = vector.load %arg3[%c32, %c0_21] : memref<64x32xf32, #tpu.memory_space<vmem>>, vector<30x32xf32>
    %c33 = arith.constant 33 : index
    %c0_22 = arith.constant 0 : index
    %26 = vector.load %arg3[%c33, %c0_22] : memref<64x32xf32, #tpu.memory_space<vmem>>, vector<30x32xf32>
    %c34 = arith.constant 34 : index
    %c0_23 = arith.constant 0 : index
    %27 = vector.load %arg3[%c34, %c0_23] : memref<64x32xf32, #tpu.memory_space<vmem>>, vector<30x32xf32>
    %28 = tpu.concatenate %25, %26, %27 in 1 : vector<30x32xf32>, vector<30x32xf32>, vector<30x32xf32> -> vector<30x96xf32>
    %29 = tpu.concatenate %24, %28 in 0 : vector<30x96xf32>, vector<30x96xf32> -> vector<60x96xf32>
    %cst_24 = arith.constant dense<0.000000e+00> : vector<60x16xf32>
    %30 = tpu.matmul %29, %9, %cst_24 {dimension_numbers = #tpu.dot_dimension_numbers<[1], [0], [0], [1], [0, 0, 1, 1], [], []>} : vector<60x96xf32>, vector<96x16xf32>, vector<60x16xf32> -> vector<60x16xf32>
    %31 = vector.broadcast %13 : vector<1x16xf32> to vector<60x16xf32>
    %32 = arith.addf %30, %31 : vector<60x16xf32>
    %cst_25 = arith.constant 0.000000e+00 : f32
    %33 = vector.broadcast %cst_25 : f32 to vector<60x16xf32>
    %34 = arith.cmpf ogt, %32, %33 : vector<60x16xf32>
    %cst_26 = arith.constant 0.000000e+00 : f32
    %35 = vector.broadcast %cst_26 : f32 to vector<60x16xf32>
    %36 = arith.minimumf %32, %35 : vector<60x16xf32>
    %37 = math.exp %36 : vector<60x16xf32>
    %cst_27 = arith.constant 1.000000e+00 : f32
    %38 = vector.broadcast %cst_27 : f32 to vector<60x16xf32>
    %39 = arith.subf %37, %38 : vector<60x16xf32>
    %40 = arith.select %34, %32, %39 : vector<60x16xi1>, vector<60x16xf32>
    %41 = vector.extract_strided_slice %40 {offsets = [0, 0], sizes = [30, 16], strides = [1, 1]} : vector<60x16xf32> to vector<30x16xf32>
    %c0_28 = arith.constant 0 : index
    %c0_29 = arith.constant 0 : index
    %42 = vector.load %arg4[%c0_28, %c0_29] : memref<64x16xf32, #tpu.memory_space<vmem>>, vector<30x16xf32>
    tpu.vector_store %arg4[%c0_28, %c0_29], %41 {strides = array<i32>} : memref<64x16xf32, #tpu.memory_space<vmem>>, vector<30x16xf32>,
    %43 = vector.extract_strided_slice %40 {offsets = [30, 0], sizes = [30, 16], strides = [1, 1]} : vector<60x16xf32> to vector<30x16xf32>
    %c32_30 = arith.constant 32 : index
    %c0_31 = arith.constant 0 : index
    %44 = vector.load %arg4[%c32_30, %c0_31] : memref<64x16xf32, #tpu.memory_space<vmem>>, vector<30x16xf32>
    tpu.vector_store %arg4[%c32_30, %c0_31], %43 {strides = array<i32>} : memref<64x16xf32, #tpu.memory_space<vmem>>, vector<30x16xf32>,
    %c0_32 = arith.constant 0 : index
    %c0_33 = arith.constant 0 : index
    %45 = tpu.strided_load %arg4[%c0_32, %c0_33] {strides = array<i32: 2, 1>} : memref<64x16xf32, #tpu.memory_space<vmem>>, vector<14x16xf32>
    %c1_34 = arith.constant 1 : index
    %c0_35 = arith.constant 0 : index
    %46 = tpu.strided_load %arg4[%c1_34, %c0_35] {strides = array<i32: 2, 1>} : memref<64x16xf32, #tpu.memory_space<vmem>>, vector<14x16xf32>
    %c2_36 = arith.constant 2 : index
    %c0_37 = arith.constant 0 : index
    %47 = tpu.strided_load %arg4[%c2_36, %c0_37] {strides = array<i32: 2, 1>} : memref<64x16xf32, #tpu.memory_space<vmem>>, vector<14x16xf32>
    %48 = tpu.concatenate %45, %46, %47 in 1 : vector<14x16xf32>, vector<14x16xf32>, vector<14x16xf32> -> vector<14x48xf32>
    %c32_38 = arith.constant 32 : index
    %c0_39 = arith.constant 0 : index
    %49 = tpu.strided_load %arg4[%c32_38, %c0_39] {strides = array<i32: 2, 1>} : memref<64x16xf32, #tpu.memory_space<vmem>>, vector<14x16xf32>
    %c33_40 = arith.constant 33 : index
    %c0_41 = arith.constant 0 : index
    %50 = tpu.strided_load %arg4[%c33_40, %c0_41] {strides = array<i32: 2, 1>} : memref<64x16xf32, #tpu.memory_space<vmem>>, vector<14x16xf32>
    %c34_42 = arith.constant 34 : index
    %c0_43 = arith.constant 0 : index
    %51 = tpu.strided_load %arg4[%c34_42, %c0_43] {strides = array<i32: 2, 1>} : memref<64x16xf32, #tpu.memory_space<vmem>>, vector<14x16xf32>
    %52 = tpu.concatenate %49, %50, %51 in 1 : vector<14x16xf32>, vector<14x16xf32>, vector<14x16xf32> -> vector<14x48xf32>
    %53 = tpu.concatenate %48, %52 in 0 : vector<14x48xf32>, vector<14x48xf32> -> vector<28x48xf32>
    %cst_44 = arith.constant dense<0.000000e+00> : vector<28x16xf32>
    %54 = tpu.matmul %53, %10, %cst_44 {dimension_numbers = #tpu.dot_dimension_numbers<[1], [0], [0], [1], [0, 0, 1, 1], [], []>} : vector<28x48xf32>, vector<48x16xf32>, vector<28x16xf32> -> vector<28x16xf32>
    %55 = vector.broadcast %14 : vector<1x16xf32> to vector<28x16xf32>
    %56 = arith.addf %54, %55 : vector<28x16xf32>
    %cst_45 = arith.constant 0.000000e+00 : f32
    %57 = vector.broadcast %cst_45 : f32 to vector<28x16xf32>
    %58 = arith.cmpf ogt, %56, %57 : vector<28x16xf32>
    %cst_46 = arith.constant 0.000000e+00 : f32
    %59 = vector.broadcast %cst_46 : f32 to vector<28x16xf32>
    %60 = arith.minimumf %56, %59 : vector<28x16xf32>
    %61 = math.exp %60 : vector<28x16xf32>
    %cst_47 = arith.constant 1.000000e+00 : f32
    %62 = vector.broadcast %cst_47 : f32 to vector<28x16xf32>
    %63 = arith.subf %61, %62 : vector<28x16xf32>
    %64 = arith.select %58, %56, %63 : vector<28x16xi1>, vector<28x16xf32>
    %65 = vector.extract_strided_slice %64 {offsets = [0, 0], sizes = [14, 16], strides = [1, 1]} : vector<28x16xf32> to vector<14x16xf32>
    %c0_48 = arith.constant 0 : index
    %c0_49 = arith.constant 0 : index
    %66 = vector.load %arg5[%c0_48, %c0_49] : memref<32x16xf32, #tpu.memory_space<vmem>>, vector<14x16xf32>
    tpu.vector_store %arg5[%c0_48, %c0_49], %65 {strides = array<i32>} : memref<32x16xf32, #tpu.memory_space<vmem>>, vector<14x16xf32>,
    %67 = vector.extract_strided_slice %64 {offsets = [14, 0], sizes = [14, 16], strides = [1, 1]} : vector<28x16xf32> to vector<14x16xf32>
    %c16 = arith.constant 16 : index
    %c0_50 = arith.constant 0 : index
    %68 = vector.load %arg5[%c16, %c0_50] : memref<32x16xf32, #tpu.memory_space<vmem>>, vector<14x16xf32>
    tpu.vector_store %arg5[%c16, %c0_50], %67 {strides = array<i32>} : memref<32x16xf32, #tpu.memory_space<vmem>>, vector<14x16xf32>,
    %c0_51 = arith.constant 0 : index
    %c0_52 = arith.constant 0 : index
    %69 = tpu.strided_load %arg5[%c0_51, %c0_52] {strides = array<i32: 2, 1>} : memref<32x16xf32, #tpu.memory_space<vmem>>, vector<6x16xf32>
    %c1_53 = arith.constant 1 : index
    %c0_54 = arith.constant 0 : index
    %70 = tpu.strided_load %arg5[%c1_53, %c0_54] {strides = array<i32: 2, 1>} : memref<32x16xf32, #tpu.memory_space<vmem>>, vector<6x16xf32>
    %c2_55 = arith.constant 2 : index
    %c0_56 = arith.constant 0 : index
    %71 = tpu.strided_load %arg5[%c2_55, %c0_56] {strides = array<i32: 2, 1>} : memref<32x16xf32, #tpu.memory_space<vmem>>, vector<6x16xf32>
    %72 = tpu.concatenate %69, %70, %71 in 1 : vector<6x16xf32>, vector<6x16xf32>, vector<6x16xf32> -> vector<6x48xf32>
    %c16_57 = arith.constant 16 : index
    %c0_58 = arith.constant 0 : index
    %73 = tpu.strided_load %arg5[%c16_57, %c0_58] {strides = array<i32: 2, 1>} : memref<32x16xf32, #tpu.memory_space<vmem>>, vector<6x16xf32>
    %c17 = arith.constant 17 : index
    %c0_59 = arith.constant 0 : index
    %74 = tpu.strided_load %arg5[%c17, %c0_59] {strides = array<i32: 2, 1>} : memref<32x16xf32, #tpu.memory_space<vmem>>, vector<6x16xf32>
    %c18 = arith.constant 18 : index
    %c0_60 = arith.constant 0 : index
    %75 = tpu.strided_load %arg5[%c18, %c0_60] {strides = array<i32: 2, 1>} : memref<32x16xf32, #tpu.memory_space<vmem>>, vector<6x16xf32>
    %76 = tpu.concatenate %73, %74, %75 in 1 : vector<6x16xf32>, vector<6x16xf32>, vector<6x16xf32> -> vector<6x48xf32>
    %77 = tpu.concatenate %72, %76 in 0 : vector<6x48xf32>, vector<6x48xf32> -> vector<12x48xf32>
    %cst_61 = arith.constant dense<0.000000e+00> : vector<12x16xf32>
    %78 = tpu.matmul %77, %11, %cst_61 {dimension_numbers = #tpu.dot_dimension_numbers<[1], [0], [0], [1], [0, 0, 1, 1], [], []>} : vector<12x48xf32>, vector<48x16xf32>, vector<12x16xf32> -> vector<12x16xf32>
    %79 = vector.broadcast %15 : vector<1x16xf32> to vector<12x16xf32>
    %80 = arith.addf %78, %79 : vector<12x16xf32>
    %cst_62 = arith.constant 0.000000e+00 : f32
    %81 = vector.broadcast %cst_62 : f32 to vector<12x16xf32>
    %82 = arith.cmpf ogt, %80, %81 : vector<12x16xf32>
    %cst_63 = arith.constant 0.000000e+00 : f32
    %83 = vector.broadcast %cst_63 : f32 to vector<12x16xf32>
    %84 = arith.minimumf %80, %83 : vector<12x16xf32>
    %85 = math.exp %84 : vector<12x16xf32>
    %cst_64 = arith.constant 1.000000e+00 : f32
    %86 = vector.broadcast %cst_64 : f32 to vector<12x16xf32>
    %87 = arith.subf %85, %86 : vector<12x16xf32>
    %88 = arith.select %82, %80, %87 : vector<12x16xi1>, vector<12x16xf32>
    %89 = vector.extract_strided_slice %88 {offsets = [0, 0], sizes = [6, 16], strides = [1, 1]} : vector<12x16xf32> to vector<6x16xf32>
    %c0_65 = arith.constant 0 : index
    %c0_66 = arith.constant 0 : index
    %90 = vector.load %arg6[%c0_65, %c0_66] : memref<16x16xf32, #tpu.memory_space<vmem>>, vector<6x16xf32>
    tpu.vector_store %arg6[%c0_65, %c0_66], %89 {strides = array<i32>} : memref<16x16xf32, #tpu.memory_space<vmem>>, vector<6x16xf32>,
    %91 = vector.extract_strided_slice %88 {offsets = [6, 0], sizes = [6, 16], strides = [1, 1]} : vector<12x16xf32> to vector<6x16xf32>
    %c8 = arith.constant 8 : index
    %c0_67 = arith.constant 0 : index
    %92 = vector.load %arg6[%c8, %c0_67] : memref<16x16xf32, #tpu.memory_space<vmem>>, vector<6x16xf32>
    tpu.vector_store %arg6[%c8, %c0_67], %91 {strides = array<i32>} : memref<16x16xf32, #tpu.memory_space<vmem>>, vector<6x16xf32>,
    %c0_68 = arith.constant 0 : index
    %c0_69 = arith.constant 0 : index
    %93 = vector.load %arg6[%c0_68, %c0_69] : memref<16x16xf32, #tpu.memory_space<vmem>>, vector<4x16xf32>
    %c1_70 = arith.constant 1 : index
    %c0_71 = arith.constant 0 : index
    %94 = vector.load %arg6[%c1_70, %c0_71] : memref<16x16xf32, #tpu.memory_space<vmem>>, vector<4x16xf32>
    %c2_72 = arith.constant 2 : index
    %c0_73 = arith.constant 0 : index
    %95 = vector.load %arg6[%c2_72, %c0_73] : memref<16x16xf32, #tpu.memory_space<vmem>>, vector<4x16xf32>
    %96 = tpu.concatenate %93, %94, %95 in 1 : vector<4x16xf32>, vector<4x16xf32>, vector<4x16xf32> -> vector<4x48xf32>
    %c8_74 = arith.constant 8 : index
    %c0_75 = arith.constant 0 : index
    %97 = vector.load %arg6[%c8_74, %c0_75] : memref<16x16xf32, #tpu.memory_space<vmem>>, vector<4x16xf32>
    %c9 = arith.constant 9 : index
    %c0_76 = arith.constant 0 : index
    %98 = vector.load %arg6[%c9, %c0_76] : memref<16x16xf32, #tpu.memory_space<vmem>>, vector<4x16xf32>
    %c10 = arith.constant 10 : index
    %c0_77 = arith.constant 0 : index
    %99 = vector.load %arg6[%c10, %c0_77] : memref<16x16xf32, #tpu.memory_space<vmem>>, vector<4x16xf32>
    %100 = tpu.concatenate %97, %98, %99 in 1 : vector<4x16xf32>, vector<4x16xf32>, vector<4x16xf32> -> vector<4x48xf32>
    %101 = tpu.concatenate %96, %100 in 0 : vector<4x48xf32>, vector<4x48xf32> -> vector<8x48xf32>
    %cst_78 = arith.constant dense<0.000000e+00> : vector<8x16xf32>
    %102 = tpu.matmul %101, %12, %cst_78 {dimension_numbers = #tpu.dot_dimension_numbers<[1], [0], [0], [1], [0, 0, 1, 1], [], []>} : vector<8x48xf32>, vector<48x16xf32>, vector<8x16xf32> -> vector<8x16xf32>
    %103 = vector.broadcast %16 : vector<1x16xf32> to vector<8x16xf32>
    %104 = arith.addf %102, %103 : vector<8x16xf32>
    %cst_79 = arith.constant 0.000000e+00 : f32
    %105 = vector.broadcast %cst_79 : f32 to vector<8x16xf32>
    %106 = arith.cmpf ogt, %104, %105 : vector<8x16xf32>
    %cst_80 = arith.constant 0.000000e+00 : f32
    %107 = vector.broadcast %cst_80 : f32 to vector<8x16xf32>
    %108 = arith.minimumf %104, %107 : vector<8x16xf32>
    %109 = math.exp %108 : vector<8x16xf32>
    %cst_81 = arith.constant 1.000000e+00 : f32
    %110 = vector.broadcast %cst_81 : f32 to vector<8x16xf32>
    %111 = arith.subf %109, %110 : vector<8x16xf32>
    %112 = arith.select %106, %104, %111 : vector<8x16xi1>, vector<8x16xf32>
    %113 = vector.extract_strided_slice %112 {offsets = [0, 0], sizes = [4, 16], strides = [1, 1]} : vector<8x16xf32> to vector<4x16xf32>
    %cst_82 = arith.constant dense<0.000000e+00> : vector<16xf32>
    %114 = vector.multi_reduction <add>, %113, %cst_82 [0] : vector<4x16xf32> to vector<16xf32>
    %115 = vector.shape_cast %114 : vector<16xf32> to vector<1x16xf32>
    %cst_83 = arith.constant 4.000000e+00 : f32
    %116 = vector.broadcast %cst_83 : f32 to vector<1x16xf32>
    %117 = arith.divf %115, %116 : vector<1x16xf32>
    %118 = vector.extract_strided_slice %112 {offsets = [4, 0], sizes = [4, 16], strides = [1, 1]} : vector<8x16xf32> to vector<4x16xf32>
    %cst_84 = arith.constant dense<0.000000e+00> : vector<16xf32>
    %119 = vector.multi_reduction <add>, %118, %cst_84 [0] : vector<4x16xf32> to vector<16xf32>
    %120 = vector.shape_cast %119 : vector<16xf32> to vector<1x16xf32>
    %cst_85 = arith.constant 4.000000e+00 : f32
    %121 = vector.broadcast %cst_85 : f32 to vector<1x16xf32>
    %122 = arith.divf %120, %121 : vector<1x16xf32>
    %123 = tpu.concatenate %117, %122 in 0 : vector<1x16xf32>, vector<1x16xf32> -> vector<2x16xf32>
    %cst_86 = arith.constant dense<0.000000e+00> : vector<2x32xf32>
    %124 = tpu.matmul %123, %17, %cst_86 {dimension_numbers = #tpu.dot_dimension_numbers<[1], [0], [0], [1], [0, 0, 1, 1], [], []>} : vector<2x16xf32>, vector<16x32xf32>, vector<2x32xf32> -> vector<2x32xf32>
    %125 = vector.broadcast %18 : vector<1x32xf32> to vector<2x32xf32>
    %126 = arith.addf %124, %125 : vector<2x32xf32>
    %cst_87 = arith.constant 0.000000e+00 : f32
    %127 = vector.broadcast %cst_87 : f32 to vector<2x32xf32>
    %128 = arith.maximumf %126, %127 : vector<2x32xf32>
    %cst_88 = arith.constant dense<0.000000e+00> : vector<2x4xf32>
    %129 = tpu.matmul %128, %19, %cst_88 {dimension_numbers = #tpu.dot_dimension_numbers<[1], [0], [0], [1], [0, 0, 1, 1], [], []>} : vector<2x32xf32>, vector<32x4xf32>, vector<2x4xf32> -> vector<2x4xf32>
    %130 = vector.broadcast %20 : vector<1x4xf32> to vector<2x4xf32>
    %131 = arith.addf %129, %130 : vector<2x4xf32>
    %c0_89 = arith.constant 0 : index
    %c0_90 = arith.constant 0 : index
    %132 = vector.load %arg2[%c0_89, %c0_90] : memref<2x4xf32, #tpu.memory_space<vmem>>, vector<2x4xf32>
    tpu.vector_store %arg2[%c0_89, %c0_90], %131 {strides = array<i32>} : memref<2x4xf32, #tpu.memory_space<vmem>>, vector<2x4xf32>,
    return
  }
}

</mosaic_0001>

<bundles_post_ra>
// kernel: news_classifier_forward.1
= control target key start
LH: loop header
LB: loop body
LE: loop exit
PB: predicated region body
PF: predicated region fallthrough
CT: control target
= control target key end

     0   :  { %v1522_v2 = vmov 0   ;;  %s1882_s0 = inlined_call_operand.vmem [shape: s32[64,1], index: 0, kind: input, shape index: {}]   ;;  %s1883_s1 = inlined_call_operand.vmem [shape: f32[360,32], index: 1, kind: input, shape index: {}]   ;;  %s1884_s2 = inlined_call_operand.hbm [shape: f32[2,4], index: 2, kind: output, shape index: {}]  }
   0x1   :  { %v14_v0 = vld [vmem:[%s1882_s0 + $0x10] sm:$0xff]  ;;  %v12_v1 = vld [vmem:[%s1882_s0] sm:$0xff]  ;;  %1469 = vset.pattern.permute.xlu1 %v1522_v2  ;;  %1468 = vset.pattern.permute.xlu0 %v1522_v2  ;;  %v77_v3 = vld [vmem:[%s1883_s1 + $0x38] sm:$0xff] }
   0x2   :  { %29 = vperm.xlu1 %1469, %v14_v0   ;;  %23 = vperm.xlu0 %1468, %v12_v1   ;;  %v15_v4 = vld [vmem:[%s1882_s0 + $0x18] sm:$0xff]  ;;  %v13_v5 = vld [vmem:[%s1882_s0 + $0x8] sm:$0xff]  ;;  %v76_v6 = vld [vmem:[%s1883_s1 + $0x30] sm:$0xff] }
   0x3   :  { %1331 = vmatprep.subr.mxu0 %v77_v3  ;;  %v75_v7 = vld [vmem:[%s1883_s1 + $0x28] sm:$0xff] }
   0x4   :  { %1332 = vmatpush3.msra.mxu0 %v77_v3 }
   0x5   :  { %1333 = vmatprep.subr.mxu0 %v76_v6 }
   0x6   :  { %7 = vsyncpa [#allocation7], 0  ;;  %32 = vperm.xlu1 %1469, %v15_v4   ;;  %26 = vperm.xlu0 %1468, %v13_v5   ;;  %v17_v8 = vld [vmem:[%s1882_s0 + $0x28] sm:$0xff]  ;;  %v16_v9 = vld [vmem:[%s1882_s0 + $0x20] sm:$0xff]  ;;  %v20_v17 = vlaneseq  ;;  %vm78_vm0 = vcmask 523264   ;;  %v1523_v21 = vmov 0.0  }
   0x7   :  { %1334 = vmatpush3.msra.mxu0 %v76_v6  ;;  %v74_v10 = vld [vmem:[%s1883_s1 + $0x20] sm:$0xff]  ;;  %v73_v11 = vld [vmem:[%s1883_s1 + $0x18] sm:$0xff]  ;;  %v18_v13 = vld [vmem:[%s1882_s0 + $0x30] sm:$0xff]  ;;  %vm208_vm9 = vcmask 261120   ;;  %s1524_s6 = smov 32   ;;  %s1525_s9 = smov 64  }
   0x8   :  { %1335 = vmatprep.subr.mxu0 %v75_v7  ;;  %v19_v12 = vld [vmem:[%s1882_s0 + $0x38] sm:$0xff]  ;;  %v72_v14 = vld [vmem:[%s1883_s1 + $0x10] sm:$0xff]  ;;  %v71_v15 = vld [vmem:[%s1883_s1 + $0x8] sm:$0xff]  ;;  %v21_v18 = vand.u32 127, %v20_v17  ;;  %vm381_vm10 = vcmask 785408   ;;  %vm367_vm11 = vcmask 1045504  }
   0x9   :  { %1336 = vmatpush3.msra.mxu0 %v75_v7  ;;  %v70_v16 = vld [vmem:[%s1883_s1] sm:$0xff]  ;;  %v228_v36 = vld [vmem:[%s1883_s1 + $0x98] sm:$0xff]  ;;  %v227_v37 = vld [vmem:[%s1883_s1 + $0x90] sm:$0xff]  ;;  %vm555_vm12 = vcmask 130048   ;;  %vm559_vm15 = vcmask 128000   ;;  %s1526_s19 = smov 16  }
   0xa   :  { %38 = vperm.xlu1 %1469, %v17_v8   ;;  %35 = vperm.xlu0 %1468, %v16_v9   ;;  %v226_v38 = vld [vmem:[%s1883_s1 + $0x88] sm:$0xff]  ;;  %v225_v39 = vld [vmem:[%s1883_s1 + $0x80] sm:$0xff]  ;;  %v224_v40 = vld [vmem:[%s1883_s1 + $0x78] sm:$0xff]  ;;  %s1528_s13 = smov [#allocation6]  }
   0xb   :  { %1337 = vmatprep.subr.mxu0 %v74_v10  ;;  %1359 = vmatprep.subr.mxu1 %v228_v36  ;;  %v223_v41 = vld [vmem:[%s1883_s1 + $0x70] sm:$0xff]  ;;  %v222_v43 = vld [vmem:[%s1883_s1 + $0x68] sm:$0xff]  ;;  %v221_v44 = vld [vmem:[%s1883_s1 + $0x60] sm:$0xff]  ;;  %s1200_s14 = sshll.u32 %s1528_s13, 4  ;;  %s1201_s14 = int_to_ptr.vmem [resolvable:$true] %s1200_s14 }
   0xc   :  { %1338 = vmatpush3.msra.mxu0 %v74_v10  ;;  %1360 = vmatpush3.msra.mxu1 %v228_v36  ;;  %v220_v47 = vld [vmem:[%s1883_s1 + $0x58] sm:$0xff]  ;;  %v219_v49 = vld [vmem:[%s1883_s1 + $0x50] sm:$0xff]  ;;  %v218_v51 = vld [vmem:[%s1883_s1 + $0x48] sm:$0xff]  ;;  %s1500_s15 = scalar_lea.vmem %s1201_s14, 32  ;;  %p1505_p1 = scmp.lt.s32.totalorder %s1201_s14, %s1201_s14 }
   0xd   :  { %1339 = vmatprep.subr.mxu0 %v73_v11  ;;  %1361 = vmatprep.subr.mxu1 %v227_v37  ;;  %v217_v54 = vld [vmem:[%s1883_s1 + $0x40] sm:$0xff]  ;;  %p1501_p0 = scmp.ne.s32.totalorder %s1201_s14, %s1500_s15  ;;  %p1506_p2 = scmp.lt.s32.totalorder %s1500_s15, %s1500_s15 }
   0xe   :  { %44 = vperm.xlu1 %1469, %v19_v12   ;;  %41 = vperm.xlu0 %1468, %v18_v13  }
   0xf   :  { %1340 = vmatpush3.msra.mxu0 %v73_v11  ;;  %1362 = vmatpush3.msra.mxu1 %v227_v37  ;;  %p1507_p3 = por %p1506_p2, %p1505_p1 }
  0x10   :  { %1341 = vmatprep.subr.mxu0 %v72_v14  ;;  %1363 = vmatprep.subr.mxu1 %v226_v38 }
  0x11   :  { %1342 = vmatpush3.msra.mxu0 %v72_v14  ;;  %1364 = vmatpush3.msra.mxu1 %v226_v38  ;;  %p1508_p4 = pnand %p1507_p3, %p1501_p0 }
  0x12   :  { %1343 = vmatprep.subr.mxu0 %v71_v15  ;;  %1365 = vmatprep.subr.mxu1 %v225_v39 }
  0x13   :  { %1344 = vmatpush3.msra.mxu0 %v71_v15  ;;  %1366 = vmatpush3.msra.mxu1 %v225_v39 }
  0x14   :  { %1345 = vmatprep.subr.mxu0 %v70_v16  ;;  %1367 = vmatprep.subr.mxu1 %v224_v40 }
  0x15   :  { %1346 = vmatpush3.msra.mxu0 %v70_v16  ;;  %1368 = vmatpush3.msra.mxu1 %v224_v40 }
  0x16   :  { %1369 = vmatprep.subr.mxu1 %v223_v41 }
  0x17   :  { %1370 = vmatpush3.msra.mxu1 %v223_v41 }
  0x18   :  { %1371 = vmatprep.subr.mxu1 %v222_v43 }
  0x19   :  { %1372 = vmatpush3.msra.mxu1 %v222_v43 }
  0x1a   :  { %1373 = vmatprep.subr.mxu1 %v221_v44 }
  0x1b   :  { %1374 = vmatpush3.msra.mxu1 %v221_v44 }
  0x1c   :  { %1375 = vmatprep.subr.mxu1 %v220_v47 }
  0x1d   :  { %1376 = vmatpush3.msra.mxu1 %v220_v47 }
  0x1e   :  { %1377 = vmatprep.subr.mxu1 %v219_v49 }
  0x1f   :  { %1378 = vmatpush3.msra.mxu1 %v219_v49 }
  0x20   :  { %1379 = vmatprep.subr.mxu1 %v218_v51 }
  0x21   :  { %1380 = vmatpush3.msra.mxu1 %v218_v51 }
  0x22   :  { %1381 = vmatprep.subr.mxu1 %v217_v54 }
  0x23   :  { %1382 = vmatpush3.msra.mxu1 %v217_v54 }
  0x7d   :  { %v30_v19 = vpop.permute.xlu1 %29  ;;  %v24_v20 = vpop.permute.xlu0 %23 }
  0x7e   :  { %vm46_vm1 = vcmp.eq.s32.totalorder %v21_v18, %v24_v20  ;;  %vm48_vm2 = vcmp.eq.s32.totalorder %v21_v18, %v30_v19 }
  0x7f   :  { %v1208_v22 = vsel %vm46_vm1, 1.0, %v1523_v21  ;;  %v1210_v25 = vsel %vm48_vm2, 1.0, %v1523_v21 }
  0x80   :  { %1347 = vmatprep.mubr.msk.f32.mxu0 %vm78_vm0, %v1208_v22 }
  0x81   :  { %v33_v23 = vpop.permute.xlu1 %32  ;;  %v27_v24 = vpop.permute.xlu0 %26 }
  0x82   :  { %vm47_vm3 = vcmp.eq.s32.totalorder %v21_v18, %v27_v24  ;;  %vm49_vm4 = vcmp.eq.s32.totalorder %v21_v18, %v33_v23 }
  0x83   :  { %v1209_v26 = vsel %vm47_vm3, 1.0, %v1523_v21  ;;  %v1211_v29 = vsel %vm49_vm4, 1.0, %v1523_v21 }
  0x84   :  { %1348 = vmatmul.mubr.msk.f32.vlgmr.msra.gmra.mxu0 %vm78_vm0, %v1209_v26 }
  0x85   :  { %v39_v27 = vpop.permute.xlu1 %38  ;;  %1350 = vmatprep.mubr.msk.f32.mxu0 %vm78_vm0, %v1210_v25  ;;  %v36_v28 = vpop.permute.xlu0 %35 }
  0x86   :  { %vm50_vm5 = vcmp.eq.s32.totalorder %v21_v18, %v36_v28  ;;  %vm51_vm6 = vcmp.eq.s32.totalorder %v21_v18, %v39_v27 }
  0x87   :  { %v1212_v30 = vsel %vm50_vm5, 1.0, %v1523_v21  ;;  %v1213_v33 = vsel %vm51_vm6, 1.0, %v1523_v21  ;;  %vm566_vm5 = vcmask 125952  }
  0x88   :  { %1351 = vmatmul.mubr.msk.f32.gmra.mxu0 %vm78_vm0, %v1211_v29 }
  0x89   :  { %v45_v31 = vpop.permute.xlu1 %44  ;;  %1353 = vmatprep.mubr.msk.f32.mxu0 %vm78_vm0, %v1212_v30  ;;  %v42_v32 = vpop.permute.xlu0 %41 }
  0x8a   :  { %vm52_vm7 = vcmp.eq.s32.totalorder %v21_v18, %v42_v32  ;;  %vm53_vm8 = vcmp.eq.s32.totalorder %v21_v18, %v45_v31 }
  0x8b   :  { %v1214_v34 = vsel %vm52_vm7, 1.0, %v1523_v21  ;;  %v1215_v35 = vsel %vm53_vm8, 1.0, %v1523_v21  ;;  %vm642_vm8 = vcmask 392192  }
  0x8c   :  { %1354 = vmatmul.mubr.msk.f32.gmra.mxu0 %vm78_vm0, %v1213_v33 }
  0x8d   :  { %1356 = vmatprep.mubr.msk.f32.mxu0 %vm78_vm0, %v1214_v34 }
  0x90   :  { %1357 = vmatmul.mubr.msk.f32.gmra.mxu0 %vm78_vm0, %v1215_v35 }
 0x144   :  { %v1349_v42 = vpop.f32.mrf.mxu0 }
 0x145   :  { %210 = vst.msk [vmem:[#allocation2 + $0x8] sm:$0xff] %vm208_vm9, %v1349_v42 }
 0x146   :  { %v169_v45 = vpop.f32.mrf.mxu0 }
 0x147   :  { %209 = vst.msk [vmem:[#allocation2] sm:$0xff] %vm208_vm9, %v169_v45 }
 0x148   :  { %v1352_v46 = vpop.f32.mrf.mxu0 }
 0x149   :  { %212 = vst.msk [vmem:[#allocation2 + $0x18] sm:$0xff] %vm208_vm9, %v1352_v46 }
 0x14a   :  { %v179_v48 = vpop.f32.mrf.mxu0 }
 0x14b   :  { %211 = vst.msk [vmem:[#allocation2 + $0x10] sm:$0xff] %vm208_vm9, %v179_v48 }
 0x14c   :  { %v1355_v50 = vpop.f32.mrf.mxu0  ;;  %v260_v18 = vld [vmem:[#allocation2 + $0x8] sm:$0xff] }
 0x14d   :  { %214 = vst.msk [vmem:[#allocation2 + $0x28] sm:$0xff] %vm208_vm9, %v1355_v50 }
 0x14e   :  { %v189_v52 = vpop.f32.mrf.mxu0  ;;  %v263_v53 = vld [vmem:[#allocation2 + $0x1] sm:$0xff] }
 0x14f   :  { %213 = vst.msk [vmem:[#allocation2 + $0x20] sm:$0xff] %vm208_vm9, %v189_v52  ;;  %275 = vrot.lane.b32.xlu0 %v263_v53, %s1524_s6  ;;  %v267_v58 = vld [vmem:[#allocation2 + $0x2] sm:$0xff] }
 0x150   :  { %v1358_v55 = vpop.f32.mrf.mxu0  ;;  %v266_v56 = vld [vmem:[#allocation2 + $0x19] sm:$0x3f]  ;;  %v259_v10 = vld [vmem:[#allocation2] sm:$0xff] }
 0x151   :  { %216 = vst.msk [vmem:[#allocation2 + $0x38] sm:$0xff] %vm208_vm9, %v1358_v55  ;;  %281 = vrot.lane.b32.xlu1 %v266_v56, %s1524_s6  ;;  %v270_v59 = vld [vmem:[#allocation2 + $0x1a] sm:$0x3f] }
 0x152   :  { %v199_v57 = vpop.f32.mrf.mxu0  ;;  %v265_v60 = vld [vmem:[#allocation2 + $0x11] sm:$0xff]  ;;  %v264_v61 = vld [vmem:[#allocation2 + $0x9] sm:$0xff] }
 0x153   :  { %215 = vst.msk [vmem:[#allocation2 + $0x30] sm:$0xff] %vm208_vm9, %v199_v57  ;;  %291 = vrot.lane.b32.xlu0 %v267_v58, %s1525_s9  ;;  %v269_v62 = vld [vmem:[#allocation2 + $0x12] sm:$0xff]  ;;  %v268_v63 = vld [vmem:[#allocation2 + $0xa] sm:$0xff]  ;;  %v1224_v57 = vld [vmem:[%s1883_s1 + $0x160] ss:$0 sm:$0xff] }
 0x154   :  { %v261_v19 = vld [vmem:[#allocation2 + $0x10] sm:$0xff]  ;;  %v262_v30 = vld [vmem:[#allocation2 + $0x18] sm:$0x3f]  ;;  %v312_v38 = vld [vmem:[#allocation2 + $0x28] sm:$0xff] }
 0x155   :  { %297 = vrot.lane.b32.xlu1 %v270_v59, %s1525_s9 }
 0x156   :  { %v315_v0 = vld [vmem:[#allocation2 + $0x21] sm:$0xff] }
 0x157   :  { %279 = vrot.lane.b32.xlu0 %v265_v60, %s1524_s6  ;;  %v319_v1 = vld [vmem:[#allocation2 + $0x22] sm:$0xff] }
 0x158   :  { %v318_v6 = vld [vmem:[#allocation2 + $0x39] sm:$0x3f]  ;;  %v311_v26 = vld [vmem:[#allocation2 + $0x20] sm:$0xff] }
 0x159   :  { %277 = vrot.lane.b32.xlu1 %v264_v61, %s1524_s6  ;;  %v322_v7 = vld [vmem:[#allocation2 + $0x3a] sm:$0x3f] }
 0x15a   :  { %v316_v2 = vld [vmem:[#allocation2 + $0x29] sm:$0xff]  ;;  %v317_v3 = vld [vmem:[#allocation2 + $0x31] sm:$0xff] }
 0x15b   :  { %295 = vrot.lane.b32.xlu0 %v269_v62, %s1525_s9  ;;  %v320_v4 = vld [vmem:[#allocation2 + $0x2a] sm:$0xff]  ;;  %v321_v5 = vld [vmem:[#allocation2 + $0x32] sm:$0xff] }
 0x15c   :  { %v313_v41 = vld [vmem:[#allocation2 + $0x30] sm:$0xff]  ;;  %v314_v48 = vld [vmem:[#allocation2 + $0x38] sm:$0x3f] }
 0x15d   :  { %293 = vrot.lane.b32.xlu1 %v268_v63, %s1525_s9 }
 0x15f   :  { %327 = vrot.lane.b32.xlu0 %v315_v0, %s1524_s6 }
 0x161   :  { %343 = vrot.lane.b32.xlu1 %v319_v1, %s1525_s9 }
 0x163   :  { %329 = vrot.lane.b32.xlu0 %v316_v2, %s1524_s6 }
 0x165   :  { %331 = vrot.lane.b32.xlu1 %v317_v3, %s1524_s6 }
 0x167   :  { %345 = vrot.lane.b32.xlu0 %v320_v4, %s1525_s9 }
 0x169   :  { %347 = vrot.lane.b32.xlu1 %v321_v5, %s1525_s9 }
 0x16b   :  { %333 = vrot.lane.b32.xlu0 %v318_v6, %s1524_s6 }
 0x16d   :  { %349 = vrot.lane.b32.xlu1 %v322_v7, %s1525_s9 }
 0x1c1   :  { %v276_v8 = vpop.permute.xlu0 %275 }
 0x1c2   :  { %v303_v11 = vsel %vm208_vm9, %v259_v10, %v276_v8 }
 0x1c3   :  { %v282_v9 = vpop.permute.xlu1 %281 }
 0x1c4   :  { %v306_v32 = vsel %vm208_vm9, %v262_v30, %v282_v9 }
 0x1c5   :  { %v292_v12 = vpop.permute.xlu0 %291 }
 0x1c6   :  { %v307_v13 = vsel %vm78_vm0, %v303_v11, %v292_v12 }
 0x1c7   :  { %v298_v14 = vpop.permute.xlu1 %297  ;;  %1383 = vmatprep.mubr.msk.f32.mxu1 %vm381_vm10, %v307_v13 }
 0x1c8   :  { %v310_v35 = vsel %vm78_vm0, %v306_v32, %v298_v14 }
 0x1c9   :  { %v280_v15 = vpop.permute.xlu0 %279 }
 0x1ca   :  { %v305_v23 = vsel %vm208_vm9, %v261_v19, %v280_v15 }
 0x1cb   :  { %v278_v16 = vpop.permute.xlu1 %277 }
 0x1cc   :  { %v304_v20 = vsel %vm208_vm9, %v260_v18, %v278_v16 }
 0x1cd   :  { %v296_v17 = vpop.permute.xlu0 %295 }
 0x1ce   :  { %v309_v25 = vsel %vm78_vm0, %v305_v23, %v296_v17 }
 0x1cf   :  { %v294_v22 = vpop.permute.xlu1 %293 }
 0x1d0   :  { %v308_v24 = vsel %vm78_vm0, %v304_v20, %v294_v22  ;;  %v234_v22 = vld [vmem:[%s1883_s1 + $0xc8] sm:$0xff] }
 0x1d1   :  { %1384 = vmatmul.mubr.msk.f32.vlgmr.msra.gmra.mxu1 %vm381_vm10, %v308_v24  ;;  %v328_v27 = vpop.permute.xlu0 %327  ;;  %1395 = vmatprep.subr.mxu0 %v234_v22 }
 0x1d2   :  { %v355_v28 = vsel %vm208_vm9, %v311_v26, %v328_v27  ;;  %1386 = vmatprep.mubr.msk.f32.mxu1 %vm381_vm10, %v309_v25  ;;  %1396 = vmatpush3.msra.mxu0 %v234_v22 }
 0x1d3   :  { %v344_v29 = vpop.permute.xlu1 %343 }
 0x1d4   :  { %v359_v31 = vsel %vm78_vm0, %v355_v28, %v344_v29 }
 0x1d5   :  { %v368_v33 = vrot.slane %v359_v31, 2  ;;  %v330_v34 = vpop.permute.xlu0 %329 }
 0x1d6   :  { %v356_v39 = vsel %vm208_vm9, %v312_v38, %v330_v34 }
 0x1d7   :  { %v332_v36 = vpop.permute.xlu1 %331  ;;  %v376_v37 = vsel %vm367_vm11, %v310_v35, %v368_v33 }
 0x1d8   :  { %1387 = vmatmul.mubr.msk.f32.gmra.mxu1 %vm381_vm10, %v376_v37  ;;  %v357_v43 = vsel %vm208_vm9, %v313_v41, %v332_v36  ;;  %v233_v36 = vld [vmem:[%s1883_s1 + $0xc0] sm:$0xff]  ;;  %v232_v41 = vld [vmem:[%s1883_s1 + $0xb8] sm:$0xff] }
 0x1d9   :  { %v346_v40 = vpop.permute.xlu0 %345  ;;  %1397 = vmatprep.subr.mxu0 %v233_v36 }
 0x1da   :  { %v360_v42 = vsel %vm78_vm0, %v356_v39, %v346_v40  ;;  %1398 = vmatpush3.msra.mxu0 %v233_v36 }
 0x1db   :  { %v369_v44 = vrot.slane %v360_v42, 2  ;;  %v348_v45 = vpop.permute.xlu1 %347  ;;  %v231_v42 = vld [vmem:[%s1883_s1 + $0xb0] sm:$0xff]  ;;  %1399 = vmatprep.subr.mxu0 %v232_v41 }
 0x1dc   :  { %v361_v46 = vsel %vm78_vm0, %v357_v43, %v348_v45  ;;  %1400 = vmatpush3.msra.mxu0 %v232_v41 }
 0x1dd   :  { %v371_v47 = vrot.slane %v361_v46, 2  ;;  %v334_v49 = vpop.permute.xlu0 %333  ;;  %v370_v50 = vsel %vm367_vm11, %v368_v33, %v369_v44  ;;  %1401 = vmatprep.subr.mxu0 %v231_v42 }
 0x1de   :  { %v358_v51 = vsel %vm208_vm9, %v314_v48, %v334_v49  ;;  %1389 = vmatprep.mubr.msk.f32.mxu1 %vm381_vm10, %v370_v50  ;;  %1402 = vmatpush3.msra.mxu0 %v231_v42  ;;  %v230_v49 = vld [vmem:[%s1883_s1 + $0xa8] sm:$0xff]  ;;  %v229_v50 = vld [vmem:[%s1883_s1 + $0xa0] sm:$0xff] }
 0x1df   :  { %v350_v52 = vpop.permute.xlu1 %349  ;;  %v372_v53 = vsel %vm367_vm11, %v369_v44, %v371_v47  ;;  %1403 = vmatprep.subr.mxu0 %v230_v49 }
 0x1e0   :  { %v362_v54 = vsel %vm78_vm0, %v358_v51, %v350_v52  ;;  %1390 = vmatmul.mubr.msk.f32.gmra.mxu1 %vm381_vm10, %v372_v53  ;;  %vm561_vm0 = vcmask 130054   ;;  %1404 = vmatpush3.msra.mxu0 %v230_v49 }
 0x1e1   :  { %v373_v55 = vrot.slane %v362_v54, 2  ;;  %1405 = vmatprep.subr.mxu0 %v229_v50 }
 0x1e2   :  { %1406 = vmatpush3.msra.mxu0 %v229_v50 }
 0x1e3   :  { %v374_v56 = vsel %vm367_vm11, %v371_v47, %v373_v55  ;;  %1428 = vmatprep.subr.mxu0 %v1523_v21 }
 0x1e4   :  { %1392 = vmatprep.mubr.msk.f32.mxu1 %vm381_vm10, %v374_v56 }
 0x1e5   :  { %1393 = vmatmul.mubr.msk.f32.gmra.mxu1 %vm381_vm10, %v373_v55 }
 0x291   :  { %v1385_v58 = vpop.f32.mrf.mxu1 }
 0x292   :  { %v474_v59 = vadd.f32 %v1385_v58, %v1224_v57 }
 0x293   :  { %v468_v60 = vpop.f32.mrf.mxu1 }
 0x294   :  { %v516_v61 = vmin.f32 %v474_v59, 0.0  ;;  %v469_v62 = vadd.f32 %v1224_v57, %v468_v60  ;;  %vm508_vm13 = vcmp.gt.f32.partialorder %v474_v59, 0.0 }
 0x296   :  { %v525_v63 = vmul.f32 1.442695, %v516_v61  ;;  %v515_v0 = vmin.f32 %v469_v62, 0.0  ;;  %vm507_vm14 = vcmp.gt.f32.partialorder %v469_v62, 0.0 }
 0x298   :  { %1470 = vpow2.f32 %v525_v63  ;;  %v523_v1 = vmul.f32 1.442695, %v515_v0  ;;  %v1388_v2 = vpop.f32.mrf.mxu1 }
 0x299   :  { %v484_v3 = vadd.f32 %v1388_v2, %v1224_v57 }
 0x29a   :  { %1472 = vpow2.f32 %v523_v1  ;;  %v478_v4 = vpop.f32.mrf.mxu1 }
 0x29b   :  { %v518_v5 = vmin.f32 %v484_v3, 0.0  ;;  %v479_v6 = vadd.f32 %v1224_v57, %v478_v4  ;;  %vm510_vm1 = vcmp.gt.f32.partialorder %v484_v3, 0.0 }
 0x29d   :  { %v529_v7 = vmul.f32 1.442695, %v518_v5  ;;  %v517_v8 = vmin.f32 %v479_v6, 0.0  ;;  %vm509_vm2 = vcmp.gt.f32.partialorder %v479_v6, 0.0 }
 0x29f   :  { %1474 = vpow2.f32 %v529_v7  ;;  %v527_v9 = vmul.f32 1.442695, %v517_v8 }
 0x2a0   :  { %v1391_v10 = vpop.f32.mrf.mxu1 }
 0x2a1   :  { %1476 = vpow2.f32 %v527_v9  ;;  %v1691_v11 = vadd.f32 %v1391_v10, %v1224_v57 }
 0x2a2   :  { %v488_v12 = vpop.f32.mrf.mxu1 }
 0x2a3   :  { %v520_v13 = vmin.f32 %v1691_v11, 0.0  ;;  %v1694_v14 = vadd.f32 %v1224_v57, %v488_v12  ;;  %vm512_vm3 = vcmp.gt.f32.partialorder %v1691_v11, 0.0 }
 0x2a5   :  { %v1471_v15 = vpop.eup %1470  ;;  %v533_v16 = vmul.f32 1.442695, %v520_v13  ;;  %v519_v17 = vmin.f32 %v1694_v14, 0.0  ;;  %v1394_v18 = vpop.f32.mrf.mxu1  ;;  %vm511_vm4 = vcmp.gt.f32.partialorder %v1694_v14, 0.0 }
 0x2a6   :  { %v1234_v19 = vadd.f32 -1.0, %v1471_v15  ;;  %v1697_v20 = vadd.f32 %v1394_v18, %v1224_v57 }
 0x2a7   :  { %v1473_v23 = vpop.eup %1472  ;;  %1478 = vpow2.f32 %v533_v16  ;;  %v531_v24 = vmul.f32 1.442695, %v519_v17  ;;  %v498_v25 = vpop.f32.mrf.mxu1 }
 0x2a8   :  { %v548_v26 = vsel %vm508_vm13, %v474_v59, %v1234_v19  ;;  %v1233_v27 = vadd.f32 -1.0, %v1473_v23  ;;  %v522_v28 = vmin.f32 %v1697_v20, 0.0  ;;  %v1704_v29 = vadd.f32 %v1224_v57, %v498_v25 }
 0x2a9   :  { %557 = vst.msk [vmem:[#allocation3 + $0x8] sm:$0xff] %vm555_vm12, %v548_v26  ;;  %1480 = vpow2.f32 %v531_v24  ;;  %vm514_vm6 = vcmp.gt.f32.partialorder %v1697_v20, 0.0  ;;  %v240_v26 = vld [vmem:[%s1883_s1 + $0xf8] sm:$0xff] }
 0x2aa   :  { %v547_v30 = vsel %vm507_vm14, %v469_v62, %v1233_v27  ;;  %v537_v31 = vmul.f32 1.442695, %v522_v28  ;;  %v521_v32 = vmin.f32 %v1704_v29, 0.0  ;;  %vm513_vm7 = vcmp.gt.f32.partialorder %v1704_v29, 0.0  ;;  %v239_v27 = vld [vmem:[%s1883_s1 + $0xf0] sm:$0xff]  ;;  %1413 = vmatprep.subr.mxu1 %v240_v26  ;;  %v238_v28 = vld [vmem:[%s1883_s1 + $0xe8] sm:$0xff] }
 0x2ab   :  { %556 = vst.msk [vmem:[#allocation3] sm:$0xff] %vm555_vm12, %v547_v30  ;;  %1414 = vmatpush3.msra.mxu1 %v240_v26  ;;  %v1241_v30 = vld [vmem:[%s1883_s1 + $0x161] ss:$0 sm:$0xff] }
 0x2ac   :  { %v1475_v33 = vpop.eup %1474  ;;  %1482 = vpow2.f32 %v537_v31  ;;  %v535_v35 = vmul.f32 1.442695, %v521_v32  ;;  %1415 = vmatprep.subr.mxu1 %v239_v27 }
 0x2ad   :  { %v1236_v34 = vadd.f32 -1.0, %v1475_v33  ;;  %1416 = vmatpush3.msra.mxu1 %v239_v27  ;;  %v244_v27 = vld [vmem:[%s1883_s1 + $0x118] sm:$0xff] }
 0x2ae   :  { %v1477_v37 = vpop.eup %1476  ;;  %1484 = vpow2.f32 %v535_v35  ;;  %1417 = vmatprep.subr.mxu1 %v238_v28 }
 0x2af   :  { %v550_v38 = vsel %vm510_vm1, %v484_v3, %v1236_v34  ;;  %v1235_v39 = vadd.f32 -1.0, %v1477_v37  ;;  %1418 = vmatpush3.msra.mxu1 %v238_v28 }
 0x2b0   :  { %560 = vst.msk [vmem:[#allocation3 + $0x18] sm:$0x3f] %vm559_vm15, %v550_v38 }
 0x2b1   :  { %562 = vst.msk [vmem:[#allocation3 + $0x1a] sm:$0xc0] %vm561_vm0, %v550_v38  ;;  %v549_v40 = vsel %vm509_vm2, %v479_v6, %v1235_v39 }
 0x2b2   :  { %558 = vst.msk [vmem:[#allocation3 + $0x10] sm:$0xff] %vm555_vm12, %v549_v40  ;;  %v572_v43 = vld [vmem:[#allocation3 + $0x1] ss:$2 sm:$0xff]  ;;  %v568_v2 = vld [vmem:[#allocation3] ss:$2 sm:$0xff] }
 0x2b3   :  { %581 = vrot.lane.b32.xlu0 %v572_v43, %s1526_s19 }
 0x2b4   :  { %v1479_v44 = vpop.eup %1478 }
 0x2b5   :  { %v1238_v45 = vadd.f32 -1.0, %v1479_v44 }
 0x2b6   :  { %v1481_v46 = vpop.eup %1480 }
 0x2b7   :  { %v552_v47 = vsel %vm512_vm3, %v1691_v11, %v1238_v45  ;;  %v1237_v48 = vadd.f32 -1.0, %v1481_v46  ;;  %vm1527_vm3 = vmmov 0  }
 0x2b8   :  { %564 = vst.msk [vmem:[#allocation3 + $0x2a] sm:$0xff] %vm555_vm12, %v552_v47 }
 0x2b9   :  { %v1483_v51 = vpop.eup %1482  ;;  %v551_v52 = vsel %vm511_vm4, %v1694_v14, %v1237_v48  ;;  %v576_v53 = vld [vmem:[#allocation3 + $0x2] ss:$2 sm:$0xff]  ;;  %v574_v54 = vld [vmem:[#allocation3 + $0x11] ss:$2 sm:$0x3f]  ;;  %vm1035_vm4 = vcmask 1040384  }
 0x2ba   :  { %563 = vst.msk [vmem:[#allocation3 + $0x22] sm:$0xff] %vm555_vm12, %v551_v52  ;;  %v1240_v55 = vadd.f32 -1.0, %v1483_v51  ;;  %589 = vrot.lane.b32.xlu0 %v576_v53, %s1524_s6  ;;  %583 = vrot.lane.b32.xlu1 %v574_v54, %s1526_s19  ;;  %v578_v59 = vld [vmem:[#allocation3 + $0x12] ss:$2 sm:$0x3f] }
 0x2bb   :  { %v1485_v56 = vpop.eup %1484  ;;  %v570_v12 = vld [vmem:[#allocation3 + $0x10] ss:$2 sm:$0x3f] }
 0x2bc   :  { %v554_v57 = vsel %vm514_vm6, %v1697_v20, %v1240_v55  ;;  %v1239_v58 = vadd.f32 -1.0, %v1485_v56 }
 0x2bd   :  { %567 = vst.msk [vmem:[#allocation3 + $0x3a] sm:$0xf] %vm566_vm5, %v554_v57 }
 0x2be   :  { %591 = vrot.lane.b32.xlu1 %v578_v59, %s1524_s6  ;;  %v553_v60 = vsel %vm513_vm7, %v1704_v29, %v1239_v58  ;;  %v237_v29 = vld [vmem:[%s1883_s1 + $0xe0] sm:$0xff]  ;;  %v236_v58 = vld [vmem:[%s1883_s1 + $0xd8] sm:$0xff] }
 0x2bf   :  { %565 = vst.msk [vmem:[#allocation3 + $0x32] sm:$0xff] %vm555_vm12, %v553_v60  ;;  %1419 = vmatprep.subr.mxu1 %v237_v29  ;;  %v235_v60 = vld [vmem:[%s1883_s1 + $0xd0] sm:$0xff] }
 0x2c0   :  { %1420 = vmatpush3.msra.mxu1 %v237_v29 }
 0x2c1   :  { %v608_v61 = vld [vmem:[#allocation3 + $0x22] ss:$2 sm:$0xff]  ;;  %v604_v62 = vld [vmem:[#allocation3 + $0x21] ss:$2 sm:$0xff]  ;;  %1421 = vmatprep.subr.mxu1 %v236_v58 }
 0x2c2   :  { %621 = vrot.lane.b32.xlu1 %v608_v61, %s1524_s6  ;;  %613 = vrot.lane.b32.xlu0 %v604_v62, %s1526_s19  ;;  %v600_v9 = vld [vmem:[#allocation3 + $0x20] ss:$2 sm:$0xff] }
 0x2c3   :  { %1422 = vmatpush3.msra.mxu1 %v236_v58 }
 0x2c4   :  { %1423 = vmatprep.subr.mxu1 %v235_v60 }
 0x2c5   :  { %1424 = vmatpush3.msra.mxu1 %v235_v60 }
 0x2c6   :  { %v610_v63 = vld [vmem:[#allocation3 + $0x32] ss:$2 sm:$0x3f]  ;;  %v606_v0 = vld [vmem:[#allocation3 + $0x31] ss:$2 sm:$0x3f]  ;;  %1443 = vmatprep.subr.mxu1 %v1523_v21 }
 0x2c7   :  { %623 = vrot.lane.b32.xlu1 %v610_v63, %s1524_s6  ;;  %615 = vrot.lane.b32.xlu0 %v606_v0, %s1526_s19  ;;  %v602_v19 = vld [vmem:[#allocation3 + $0x30] ss:$2 sm:$0x3f] }
 0x325   :  { %v582_v1 = vpop.permute.xlu0 %581 }
 0x326   :  { %v595_v3 = vsel %vm555_vm12, %v568_v2, %v582_v1 }
 0x32c   :  { %v584_v4 = vpop.permute.xlu1 %583  ;;  %v590_v5 = vpop.permute.xlu0 %589 }
 0x32d   :  { %v597_v6 = vsel %vm208_vm9, %v595_v3, %v590_v5  ;;  %v596_v14 = vsel %vm555_vm12, %v570_v12, %v584_v4 }
 0x32e   :  { %1407 = vmatprep.mubr.msk.f32.mxu0 %vm642_vm8, %v597_v6 }
 0x330   :  { %v592_v7 = vpop.permute.xlu1 %591 }
 0x331   :  { %v598_v16 = vsel %vm208_vm9, %v596_v14, %v592_v7  ;;  %v1250_v14 = vld [vmem:[%s1883_s1 + $0x162] ss:$0 sm:$0xff] }
 0x334   :  { %v622_v8 = vpop.permute.xlu1 %621  ;;  %v614_v10 = vpop.permute.xlu0 %613 }
 0x335   :  { %v627_v11 = vsel %vm555_vm12, %v600_v9, %v614_v10 }
 0x336   :  { %v629_v13 = vsel %vm208_vm9, %v627_v11, %v622_v8 }
 0x337   :  { %v633_v15 = vrot.slane %v629_v13, 2  ;;  %v246_v13 = vld [vmem:[%s1883_s1 + $0x128] sm:$0xff] }
 0x339   :  { %v637_v17 = vsel %vm367_vm11, %v598_v16, %v633_v15  ;;  %v624_v18 = vpop.permute.xlu1 %623  ;;  %v616_v20 = vpop.permute.xlu0 %615 }
 0x33a   :  { %1408 = vmatmul.mubr.msk.f32.vlgmr.msra.gmra.mxu0 %vm642_vm8, %v637_v17  ;;  %v628_v22 = vsel %vm555_vm12, %v602_v19, %v616_v20 }
 0x33b   :  { %v630_v23 = vsel %vm208_vm9, %v628_v22, %v624_v18  ;;  %1429 = vmatpush3.msra.mxu0 %v246_v13 }
 0x33c   :  { %v634_v24 = vrot.slane %v630_v23, 2  ;;  %1430 = vmatprep.subr.mxu0 %v1523_v21 }
 0x33e   :  { %v635_v25 = vsel %vm367_vm11, %v633_v15, %v634_v24 }
 0x33f   :  { %1410 = vmatprep.mubr.msk.f32.mxu0 %vm642_vm8, %v635_v25 }
 0x340   :  { %1411 = vmatmul.mubr.msk.f32.gmra.mxu0 %vm642_vm8, %v634_v24  ;;  %v245_v24 = vld [vmem:[%s1883_s1 + $0x120] sm:$0xff] }
 0x341   :  { %1431 = vmatpush3.msra.mxu0 %v245_v24  ;;  %1440 = vmatprep.mubr.msk.f32.mxu0 %vm1527_vm3, %v1523_v21 }
 0x342   :  { %1432 = vmatprep.subr.mxu0 %v1523_v21 }
 0x343   :  { %1433 = vmatpush3.msra.mxu0 %v244_v27 }
 0x344   :  { %1434 = vmatprep.subr.mxu0 %v1523_v21 }
 0x3fa   :  { %v1409_v31 = vpop.f32.mrf.mxu0 }
 0x3fb   :  { %v725_v32 = vadd.f32 %v1409_v31, %v1241_v30  ;;  %v243_v31 = vld [vmem:[%s1883_s1 + $0x110] sm:$0xff] }
 0x3fc   :  { %v719_v33 = vpop.f32.mrf.mxu0  ;;  %1435 = vmatpush3.msra.mxu0 %v243_v31 }
 0x3fd   :  { %v743_v34 = vmin.f32 %v725_v32, 0.0  ;;  %v720_v35 = vadd.f32 %v1241_v30, %v719_v33  ;;  %vm739_vm10 = vcmp.gt.f32.partialorder %v725_v32, 0.0  ;;  %1436 = vmatprep.subr.mxu0 %v1523_v21  ;;  %v242_v33 = vld [vmem:[%s1883_s1 + $0x108] sm:$0xff] }
 0x3fe   :  { %1437 = vmatpush3.msra.mxu0 %v242_v33 }
 0x3ff   :  { %v748_v36 = vmul.f32 1.442695, %v743_v34  ;;  %v742_v37 = vmin.f32 %v720_v35, 0.0  ;;  %vm738_vm13 = vcmp.gt.f32.partialorder %v720_v35, 0.0  ;;  %1438 = vmatprep.subr.mxu0 %v1523_v21  ;;  %v241_v34 = vld [vmem:[%s1883_s1 + $0x100] sm:$0xff] }
 0x400   :  { %v1412_v39 = vpop.f32.mrf.mxu0  ;;  %1439 = vmatpush3.msra.mxu0 %v241_v34 }
 0x401   :  { %1486 = vpow2.f32 %v748_v36  ;;  %v746_v38 = vmul.f32 1.442695, %v742_v37  ;;  %v735_v40 = vadd.f32 %v1412_v39, %v1241_v30  ;;  %1450 = vmatprep.subr.mxu0 %v1523_v21 }
 0x402   :  { %v729_v41 = vpop.f32.mrf.mxu0 }
 0x403   :  { %1488 = vpow2.f32 %v746_v38  ;;  %v745_v42 = vmin.f32 %v735_v40, 0.0  ;;  %v730_v43 = vadd.f32 %v1241_v30, %v729_v41  ;;  %vm741_vm14 = vcmp.gt.f32.partialorder %v735_v40, 0.0 }
 0x405   :  { %v752_v44 = vmul.f32 1.442695, %v745_v42  ;;  %v744_v45 = vmin.f32 %v730_v43, 0.0  ;;  %vm740_vm1 = vcmp.gt.f32.partialorder %v730_v43, 0.0 }
 0x407   :  { %1490 = vpow2.f32 %v752_v44  ;;  %v750_v46 = vmul.f32 1.442695, %v744_v45 }
 0x409   :  { %1492 = vpow2.f32 %v750_v46 }
 0x40e   :  { %v1487_v47 = vpop.eup %1486 }
 0x40f   :  { %v1247_v48 = vadd.f32 -1.0, %v1487_v47 }
 0x410   :  { %v1489_v49 = vpop.eup %1488 }
 0x411   :  { %v759_v50 = vsel %vm739_vm10, %v725_v32, %v1247_v48  ;;  %v1246_v51 = vadd.f32 -1.0, %v1489_v49 }
 0x412   :  { %763 = vst.msk [vmem:[#allocation4 + $0x8] sm:$0x3f] %vm559_vm15, %v759_v50 }
 0x413   :  { %764 = vst.msk [vmem:[#allocation4 + $0xa] sm:$0xc0] %vm561_vm0, %v759_v50  ;;  %v758_v52 = vsel %vm738_vm13, %v720_v35, %v1246_v51  ;;  %v252_v51 = vld [vmem:[%s1883_s1 + $0x138] sm:$0xff] }
 0x414   :  { %762 = vst.msk [vmem:[#allocation4] sm:$0xff] %vm555_vm12, %v758_v52  ;;  %v1491_v53 = vpop.eup %1490  ;;  %v251_v52 = vld [vmem:[%s1883_s1 + $0x130] sm:$0xff] }
 0x415   :  { %v1249_v54 = vadd.f32 -1.0, %v1491_v53  ;;  %v257_v53 = vld [vmem:[%s1883_s1 + $0x158] sm:$0xff] }
 0x416   :  { %v1493_v55 = vpop.eup %1492 }
 0x417   :  { %v761_v56 = vsel %vm741_vm14, %v735_v40, %v1249_v54  ;;  %v1248_v57 = vadd.f32 -1.0, %v1493_v55  ;;  %v1255_v54 = vld [vmem:[%s1883_s1 + $0x163] ss:$0 sm:$0xff] }
 0x418   :  { %766 = vst.msk [vmem:[#allocation4 + $0x1a] sm:$0xf] %vm566_vm5, %v761_v56 }
 0x419   :  { %v760_v59 = vsel %vm740_vm1, %v730_v43, %v1248_v57 }
 0x41a   :  { %765 = vst.msk [vmem:[#allocation4 + $0x12] sm:$0xff] %vm555_vm12, %v760_v59 }
 0x41b   :  { %v771_v63 = vld [vmem:[#allocation4 + $0x2] ss:$2 sm:$0x3f]  ;;  %v769_v0 = vld [vmem:[#allocation4 + $0x1] ss:$2 sm:$0x3f] }
 0x41c   :  { %v767_v7 = vld [vmem:[#allocation4] ss:$2 sm:$0x3f] }
 0x421   :  { %v787_v61 = vld [vmem:[#allocation4 + $0x12] ss:$2 sm:$0x3f]  ;;  %v785_v62 = vld [vmem:[#allocation4 + $0x11] ss:$2 sm:$0x3f] }
 0x422   :  { %793 = vrot.lane.b32.xlu1 %v787_v61, %s1524_s6  ;;  %789 = vrot.lane.b32.xlu0 %v785_v62, %s1526_s19  ;;  %v783_v3 = vld [vmem:[#allocation4 + $0x10] ss:$2 sm:$0x3f] }
 0x426   :  { %777 = vrot.lane.b32.xlu1 %v771_v63, %s1524_s6  ;;  %773 = vrot.lane.b32.xlu0 %v769_v0, %s1526_s19 }
 0x494   :  { %v794_v1 = vpop.permute.xlu1 %793  ;;  %v790_v2 = vpop.permute.xlu0 %789 }
 0x495   :  { %v796_v4 = vsel %vm555_vm12, %v783_v3, %v790_v2 }
 0x496   :  { %v797_v5 = vsel %vm208_vm9, %v796_v4, %v794_v1 }
 0x497   :  { %v799_v9 = vrot.slane %v797_v5, 2 }
 0x498   :  { %v778_v6 = vpop.permute.xlu1 %777  ;;  %v774_v8 = vpop.permute.xlu0 %773 }
 0x499   :  { %v780_v10 = vsel %vm555_vm12, %v767_v7, %v774_v8 }
 0x49a   :  { %v781_v11 = vsel %vm208_vm9, %v780_v10, %v778_v6 }
 0x49b   :  { %v801_v12 = vsel %vm367_vm11, %v781_v11, %v799_v9 }
 0x49c   :  { %1425 = vmatprep.mubr.msk.f32.mxu1 %vm642_vm8, %v801_v12 }
 0x49d   :  { %1426 = vmatmul.mubr.msk.f32.vlgmr.msra.gmra.mxu1 %vm642_vm8, %v799_v9 }
 0x49e   :  { %1447 = vmatprep.mubr.msk.f32.mxu1 %vm1527_vm3, %v1523_v21  ;;  %1444 = vmatpush3.msra.mxu1 %v252_v51 }
 0x49f   :  { %1445 = vmatprep.subr.mxu1 %v1523_v21 }
 0x4a0   :  { %1446 = vmatpush3.msra.mxu1 %v251_v52 }
 0x55d   :  { %v1427_v15 = vpop.f32.mrf.mxu1 }
 0x55e   :  { %v883_v16 = vadd.f32 %v1427_v15, %v1250_v14 }
 0x55f   :  { %v877_v17 = vpop.f32.mrf.mxu1 }
 0x560   :  { %v889_v18 = vmin.f32 %v883_v16, 0.0  ;;  %v878_v19 = vadd.f32 %v1250_v14, %v877_v17  ;;  %vm887_vm11 = vcmp.gt.f32.partialorder %v883_v16, 0.0  ;;  %v256_v17 = vld [vmem:[%s1883_s1 + $0x150] sm:$0xff] }
 0x562   :  { %v892_v20 = vmul.f32 1.442695, %v889_v18  ;;  %v888_v22 = vmin.f32 %v878_v19, 0.0  ;;  %vm886_vm2 = vcmp.gt.f32.partialorder %v878_v19, 0.0  ;;  %v255_v18 = vld [vmem:[%s1883_s1 + $0x148] sm:$0xff] }
 0x564   :  { %1494 = vpow2.f32 %v892_v20  ;;  %v890_v23 = vmul.f32 1.442695, %v888_v22  ;;  %v1258_v20 = vld [vmem:[%s1883_s1 + $0x164] ss:$0 sm:$0xff] }
 0x566   :  { %1496 = vpow2.f32 %v890_v23 }
 0x571   :  { %v1495_v25 = vpop.eup %1494 }
 0x572   :  { %v1254_v26 = vadd.f32 -1.0, %v1495_v25 }
 0x573   :  { %v1497_v28 = vpop.eup %1496 }
 0x574   :  { %v897_v29 = vsel %vm887_vm11, %v883_v16, %v1254_v26  ;;  %v1253_v30 = vadd.f32 -1.0, %v1497_v28  ;;  %v1260_v26 = vld [vmem:[%s1883_s1 + $0x165] ss:$0 sm:$0xff] }
 0x575   :  { %900 = vst.msk [vmem:[#allocation5 + $0xa] sm:$0xf] %vm566_vm5, %v897_v29 }
 0x576   :  { %v896_v32 = vsel %vm886_vm2, %v878_v19, %v1253_v30  ;;  %v254_v19 = vld [vmem:[%s1883_s1 + $0x140] sm:$0xff] }
 0x577   :  { %898 = vst.msk [vmem:[#allocation5] sm:$0x3f] %vm559_vm15, %v896_v32  ;;  %vm930_vm15 = vcmask 1043456  }
 0x578   :  { %899 = vst.msk [vmem:[#allocation5 + $0x2] sm:$0xc0] %vm561_vm0, %v896_v32 }
 0x57c   :  { %v916_v35 = vld [vmem:[#allocation5 + $0xa] sm:$0xf] }
 0x57d   :  { %922 = vrot.lane.b32.xlu1 %v916_v35, %s1524_s6 }
 0x57e   :  { %v903_v37 = vld [vmem:[#allocation5 + $0x2] sm:$0xf] }
 0x57f   :  { %v915_v36 = vld [vmem:[#allocation5 + $0x9] sm:$0xf]  ;;  %v902_v38 = vld [vmem:[#allocation5 + $0x1] sm:$0xf] }
 0x580   :  { %918 = vrot.lane.b32.xlu0 %v915_v36, %s1526_s19  ;;  %v914_v41 = vld [vmem:[#allocation5 + $0x8] sm:$0xf]  ;;  %v901_v45 = vld [vmem:[#allocation5] sm:$0xf] }
 0x581   :  { %909 = vrot.lane.b32.xlu1 %v903_v37, %s1524_s6 }
 0x584   :  { %905 = vrot.lane.b32.xlu0 %v902_v38, %s1526_s19 }
 0x5ef   :  { %v923_v39 = vpop.permute.xlu1 %922 }
 0x5f2   :  { %v919_v40 = vpop.permute.xlu0 %918 }
 0x5f3   :  { %v925_v42 = vsel %vm555_vm12, %v914_v41, %v919_v40  ;;  %v910_v47 = vpop.permute.xlu1 %909 }
 0x5f4   :  { %v926_v43 = vsel %vm208_vm9, %v925_v42, %v923_v39 }
 0x5f5   :  { %v928_v46 = vrot.slane %v926_v43, 4 }
 0x5f6   :  { %v906_v44 = vpop.permute.xlu0 %905 }
 0x5f7   :  { %v912_v48 = vsel %vm555_vm12, %v901_v45, %v906_v44 }
 0x5f8   :  { %v913_v49 = vsel %vm208_vm9, %v912_v48, %v910_v47 }
 0x5f9   :  { %v931_v50 = vsel %vm930_vm15, %v913_v49, %v928_v46 }
 0x5fa   :  { %1441 = vmatmul.mubr.msk.f32.vlgmr.msra.gmra.mxu0 %vm642_vm8, %v931_v50 }
 0x5fb   :  { %1458 = vmatprep.mubr.msk.f32.mxu0 %vm1527_vm3, %v1523_v21  ;;  %1451 = vmatpush3.msra.mxu0 %v257_v53 }
 0x5fc   :  { %1452 = vmatprep.subr.mxu0 %v1523_v21 }
 0x5fd   :  { %1453 = vmatpush3.msra.mxu0 %v256_v17 }
 0x5fe   :  { %1454 = vmatprep.subr.mxu0 %v1523_v21 }
 0x5ff   :  { %1455 = vmatpush3.msra.mxu0 %v255_v18 }
 0x600   :  { %1456 = vmatprep.subr.mxu0 %v1523_v21 }
 0x601   :  { %1457 = vmatpush3.msra.mxu0 %v254_v19 }
 0x6ba   :  { %v1005_v55 = vpop.f32.mrf.mxu0 }
 0x6bb   :  { %v1006_v56 = vadd.f32 %v1255_v54, %v1005_v55 }
 0x6bc   :  { %v1442_v57 = vpop.f32.mrf.mxu0 }
 0x6bd   :  { %v1010_v58 = vmin.f32 %v1006_v56, 0.0  ;;  %vm1009_vm0 = vcmp.gt.f32.partialorder %v1006_v56, 0.0 }
 0x6bf   :  { %v1011_v59 = vmul.f32 1.442695, %v1010_v58 }
 0x6c1   :  { %1498 = vpow2.f32 %v1011_v59 }
 0x6ce   :  { %v1499_v60 = vpop.eup %1498 }
 0x6cf   :  { %v1257_v61 = vadd.f32 -1.0, %v1499_v60 }
 0x6d1   :  { %v1014_v62 = vsel %vm1009_vm0, %v1006_v56, %v1257_v61 }
 0x6d2   :  { %v1015_v63 = vsel %vm566_vm5, %v1014_v62, 0.0  ;;  %v1025_v0 = vrot.slane %v1014_v62, 4 }
 0x6d3   :  { %v1016_v1 = vrot.slane %v1015_v63, 4 }
 0x6d4   :  { %v1027_v2 = vsel %vm566_vm5, %v1025_v0, 0.0 }
 0x6d5   :  { %v1017_v3 = vadd.f32 %v1016_v1, %v1015_v63  ;;  %v1028_v4 = vrot.slane %v1027_v2, 4 }
 0x6d7   :  { %v1018_v5 = vrot.slane %v1017_v3, 2  ;;  %v1029_v6 = vadd.f32 %v1028_v4, %v1027_v2 }
 0x6d9   :  { %v1019_v7 = vadd.f32 %v1018_v5, %v1017_v3  ;;  %v1030_v8 = vrot.slane %v1029_v6, 2 }
 0x6db   :  { %v1020_v9 = vrot.slane %v1019_v7, 1  ;;  %v1031_v10 = vadd.f32 %v1030_v8, %v1029_v6 }
 0x6dd   :  { %v1021_v11 = vadd.f32 %v1020_v9, %v1019_v7  ;;  %v1032_v12 = vrot.slane %v1031_v10, 1 }
 0x6df   :  { %v1033_v13 = vadd.f32 %v1032_v12, %v1031_v10  ;;  %v1023_v14 = vmul.f32 0.25, %v1021_v11 }
 0x6e1   :  { %v1034_v15 = vmul.f32 0.25, %v1033_v13 }
 0x6e3   :  { %v1036_v16 = vsel %vm1035_vm4, %v1023_v14, %v1034_v15 }
 0x6e4   :  { %1448 = vmatmul.mubr.msk.f32.vlgmr.msra.gmra.mxu1 %vm555_vm12, %v1036_v16  ;;  %vm1192_vm12 = vcmask 25600  }
 0x7a4   :  { %v1110_v22 = vpop.f32.mrf.mxu1 }
 0x7a5   :  { %v1111_v23 = vadd.f32 %v1258_v20, %v1110_v22 }
 0x7a6   :  { %v1449_v24 = vpop.f32.mrf.mxu1 }
 0x7a7   :  { %v1114_v25 = vmax.f32 %v1111_v23, 0.0 }
 0x7a9   :  { %1459 = vmatmul.mubr.msk.f32.vlgmr.msra.gmra.mxu0 %vm208_vm9, %v1114_v25 }
 0x869   :  { %v1188_v27 = vpop.f32.mrf.mxu0 }
 0x86a   :  { %v1189_v21 = vadd.f32 %v1260_v26, %v1188_v27 }
 0x86b   :  { %v1460_v28 = vpop.f32.mrf.mxu0 }
 0x86c   :  { %1193 = vst.msk [vmem:[#allocation6] sm:$0x3] %vm1192_vm12, %v1189_v21 }
 0x86d   :  { %1511 = shalt.err (!%p1508_p4)
}
 0x86e   :  { %1203 = dma.vmem_to_hbm [thread:$0]  %s1201_s14, 32, %s1884_s2, [#allocation7]  }
 0x86f   :  { %1520 = dma.done.wait [#allocation7], 32  }
 0x870   :  { %1521 = vsyncadd [#allocation7], 4294967264 }
 0x871   :  { %1207 = vsyncpa [#allocation7], 1 }

</bundles_post_ra>
